<compile_context>
chip_gen: v6e
topology: v6e:2x2x1
jax: 0.10.0
libtpu: 0.0.40
codegen_flags: <defaults>
</compile_context>

<pallas_src>
import functools
import itertools

import numpy as np
import jax
import jax.numpy as jnp
from jax import lax
from jax.experimental import pallas as pl
from jax.experimental.pallas import tpu as pltpu

F32 = jnp.float32
BF16 = jnp.bfloat16

LANE = 128
VMEM_LIMIT = 32 * 1024 * 1024


def _round_up(x, m):
    return (x + m - 1) // m * m


def _plan_tiles(total, per_lane_bytes, budget_bytes=4 << 20, max_tile=65536):
    """Pick a lane tile (multiple of 128) from a per-step VMEM byte budget; pad total to it."""
    tile = budget_bytes // max(int(per_lane_bytes), 1)
    tile = max(LANE, min(tile, max_tile))
    tile -= tile % LANE
    tile = min(tile, _round_up(total, LANE))
    padded = _round_up(total, tile)
    return tile, padded


# ----------------------------------------------------------------------------
# Matcher similarity + dice partial sums, HW tiled on the grid.
#   sim[b,n,k]  = term1 * 2*num/(mpsq + mgts)
#   num[b,n,k]  = sum_hw m_p*m_gt          (reused by det loss)
#   mpsq[b,n,1] = sum_hw m_p^2             (reused by det loss)
#   mgts[b,k,1] = sum_hw m_gt (= m_gt^2, masks are binary)
# ----------------------------------------------------------------------------
def _sim_kernel(yp_ref, ygt_ref, mp_ref, mgt_ref,
                sim_ref, num_ref, mpsq_ref, mgts_ref):
    t = pl.program_id(1)

    @pl.when(t == 0)
    def _init():
        num_ref[...] = jnp.zeros_like(num_ref)
        mpsq_ref[...] = jnp.zeros_like(mpsq_ref)
        mgts_ref[...] = jnp.zeros_like(mgts_ref)

    mp = mp_ref[0]                                      # [N, tile] bf16
    mgt = mgt_ref[0]                                    # [K, tile] bf16
    num_ref[0] += lax.dot_general(                      # MXU, f32 accumulation
        mp, mgt, (((1,), (1,)), ((), ())), preferred_element_type=F32)
    mpf = mp.astype(F32)                                # cast once, reuse
    mpsq_ref[0] += jnp.sum(mpf * mpf, axis=-1, keepdims=True)
    # m_gt is a binary mask -> sum(m_gt^2) == sum(m_gt): saves one VPU mul per element.
    mgts_ref[0] += jnp.sum(mgt.astype(F32), axis=-1, keepdims=True)

    @pl.when(t == pl.num_programs(1) - 1)
    def _fin():
        yp = yp_ref[0]                                  # [N, 1] f32
        ygt = ygt_ref[0]                                # [1, K] f32
        term1 = yp * ygt + (1.0 - yp) * (1.0 - ygt)
        denom = mpsq_ref[0] + mgts_ref[0].T             # [N,1] + [1,K]
        sim_ref[0] = term1 * (2.0 * num_ref[0] / denom)


def matching_sim(y_p, y_gt, m_p, m_gt):
    """y_p [B,N], y_gt [B,K], m_p [B,N,H,W], m_gt [B,K,H,W]."""
    B, N = y_p.shape
    K = y_gt.shape[-1]
    H, W = m_p.shape[-2:]
    HW = H * W
    mpf = m_p.reshape(B, N, HW).astype(BF16)
    mgtf = m_gt.reshape(B, K, HW).astype(BF16)

    tile, hw_pad = _plan_tiles(HW, (N + K) * 2)
    if hw_pad != HW:                                    # zero-pad: contributes 0 to all sums
        mpf = jnp.pad(mpf, ((0, 0), (0, 0), (0, hw_pad - HW)))
        mgtf = jnp.pad(mgtf, ((0, 0), (0, 0), (0, hw_pad - HW)))
    T = hw_pad // tile

    yp3 = y_p.reshape(B, N, 1).astype(F32)
    ygt3 = y_gt.reshape(B, 1, K).astype(F32)
    return pl.pallas_call(
        _sim_kernel,
        out_shape=(jax.ShapeDtypeStruct((B, N, K), F32),
                   jax.ShapeDtypeStruct((B, N, K), F32),
                   jax.ShapeDtypeStruct((B, N, 1), F32),
                   jax.ShapeDtypeStruct((B, K, 1), F32)),
        grid=(B, T),
        in_specs=[
            pl.BlockSpec((1, N, 1), lambda b, i: (b, 0, 0)),
            pl.BlockSpec((1, 1, K), lambda b, i: (b, 0, 0)),
            pl.BlockSpec((1, N, tile), lambda b, i: (b, 0, i)),
            pl.BlockSpec((1, K, tile), lambda b, i: (b, 0, i)),
        ],
        out_specs=(pl.BlockSpec((1, N, K), lambda b, i: (b, 0, 0)),
                   pl.BlockSpec((1, N, K), lambda b, i: (b, 0, 0)),
                   pl.BlockSpec((1, N, 1), lambda b, i: (b, 0, 0)),
                   pl.BlockSpec((1, K, 1), lambda b, i: (b, 0, 0))),
        compiler_params=pltpu.CompilerParams(
            dimension_semantics=("parallel", "arbitrary"),
            vmem_limit_bytes=VMEM_LIMIT),
    )(yp3, ygt3, mpf, mgtf)


# ----------------------------------------------------------------------------
# Hungarian matching (host). Exact optimum via brute force for small N/K.
# TODO(synk): linear_sum_assignment is a sequential combinatorial algorithm with no clean
# Pallas equivalent; solved exactly on host (numpy) — only valid for small N/K.
# ----------------------------------------------------------------------------
def _linear_sum_assignment_max(cost):
    n, e = cost.shape
    if e == 0:
        z = np.zeros((0,), dtype=np.int64)
        return z, z
    best = -np.inf
    best_rows = best_cols = None
    ar = np.arange(e)
    for rows in itertools.combinations(range(n), e):
        sub = cost[list(rows), :]
        for perm in itertools.permutations(range(e)):
            s = sub[ar, list(perm)].sum()
            if s > best:
                best = s
                best_rows = np.array(rows, dtype=np.int64)
                best_cols = np.array(perm, dtype=np.int64)
    return best_rows, best_cols


def hungarian_assign(sim_np, gt_size):
    B, N = sim_np.shape[:2]
    input_pos, target_pos, input_neg = [], [], []
    all_idx = np.arange(N)
    for i in range(B):
        e = int(gt_size[i])
        rows, cols = _linear_sum_assignment_max(sim_np[i, :, :e])
        input_pos.append(rows)
        target_pos.append(cols)
        input_neg.append(np.setdiff1d(all_idx, rows))
    batch_pos = np.concatenate([np.full_like(p, i) for i, p in enumerate(input_pos)])
    batch_neg = np.concatenate([np.full_like(p, i) for i, p in enumerate(input_neg)])
    input_pos = np.concatenate(input_pos)
    target_pos = np.concatenate(target_pos)
    input_neg = np.concatenate(input_neg)
    return (batch_pos, input_pos), (batch_pos, target_pos), (batch_neg, input_neg)


# ----------------------------------------------------------------------------
# Detection loss: dice numerator/denominator are gathers of the matcher partial sums
# (no second streaming pass over the masks); the rest is tiny plain-JAX vector math.
# ----------------------------------------------------------------------------
def cal_det_loss(y_p, y_gt, num, mpsq, mgts, inp_pos, gt_pos, inp_neg, alpha):
    bp, ip = inp_pos
    _, tp = gt_pos
    bn, inn = inp_neg
    y_p = y_p.astype(F32)
    y_gt = y_gt.astype(F32)
    y_p_pos = y_p[bp, ip]
    y_gt_pos = y_gt[bp, tp]
    y_p_neg = y_p[bn, inn]
    dice = 2.0 * num[bp, ip, tp] / (mpsq[bp, ip, 0] + mgts[bp, tp, 0])
    term1 = jnp.sum((1.0 - alpha) * -jnp.log(1.0 - y_p_neg))
    term2 = jnp.sum(alpha * y_gt_pos * (-y_p_pos * dice - dice * jnp.log(y_p_pos)))
    return (term1 + term2) / float(ip.shape[0] + inn.shape[0])


# ----------------------------------------------------------------------------
# Layout (affinity) loss — tiny variable-size per-batch submatrices; JAX glue.
# Faithfully reproduces the reference code (including the never-advanced index_).
# ----------------------------------------------------------------------------
def cal_lay_loss(inp_pos_indices, gt_pos_indices, A_p, A_gt, gt_size, alpha_L, eps):
    B = A_p.shape[0]
    index_ = 0  # NOTE: matches reference implementation (index_ never incremented)
    loss = jnp.asarray(0.0, dtype=F32)
    for i in range(len(gt_size)):
        e = int(gt_size[i])
        ip = np.asarray(inp_pos_indices[1][index_:index_ + e])
        Ap = A_p[i][ip][:, ip].astype(F32)
        tp = np.asarray(gt_pos_indices[1][index_:index_ + e])
        Agt = A_gt[i][tp][:, tp].astype(F32)
        omega_p = 1.0 / (jnp.sum(Agt) + eps)
        omega_n = 1.0 / (jnp.sum(1.0 - Agt) + eps)
        loss = loss \
            + jnp.sum(alpha_L * omega_p * Agt * -jnp.log(Ap + eps)) \
            + jnp.sum((1.0 - alpha_L) * omega_n * (1.0 - Agt) * -jnp.log(1.0 - Ap + eps))
    return loss / B


# ----------------------------------------------------------------------------
# Semantic segmentation BCE (sublane-dense (rows,128) layout, one log per element).
# Hot loop is a pure elementwise add into a block-shaped VMEM accumulator; the single
# cross-lane reduction happens at finalize.
# ----------------------------------------------------------------------------
def _seg_loss_kernel(p_ref, t_ref, out_ref, acc_ref, *, inv_count):
    i = pl.program_id(0)

    @pl.when(i == 0)
    def _init():
        acc_ref[...] = jnp.zeros_like(acc_ref)

    p = p_ref[...]                                      # [rows, 128] f32
    t = t_ref[...].astype(F32)                          # binary target
    # target is {0,1}: -t*log(p)-(1-t)*log(1-p) == -log(t*p + (1-t)*(1-p)): one EUP log.
    acc_ref[...] += -jnp.log(t * p + (1.0 - t) * (1.0 - p))

    @pl.when(i == pl.num_programs(0) - 1)
    def _fin():
        out_ref[...] = jnp.sum(acc_ref[...], keepdims=True) * inv_count


def cal_semantic_segmentation_loss(input_mask, target_mask):
    count = int(np.prod(target_mask.shape))             # B*H*W
    p = input_mask.reshape(-1).astype(F32)
    t = target_mask.reshape(-1).astype(BF16)            # binary -> exact in bf16

    rows = -(-count // LANE)
    row_budget = max(8, ((2 << 20) // (LANE * 6)) // 8 * 8)
    row_tile = min(row_budget, _round_up(rows, 8))
    rows_pad = _round_up(rows, row_tile)
    padded = rows_pad * LANE
    if padded != count:                                 # pad (p=1, t=1) -> zero contribution
        p = jnp.pad(p, (0, padded - count), constant_values=1.0)
        t = jnp.pad(t, (0, padded - count), constant_values=1)
    p2 = p.reshape(rows_pad, LANE)
    t2 = t.reshape(rows_pad, LANE)
    T = rows_pad // row_tile

    kern = functools.partial(_seg_loss_kernel, inv_count=1.0 / float(count))
    out = pl.pallas_call(
        kern,
        out_shape=jax.ShapeDtypeStruct((1, 1), F32),
        grid=(T,),
        in_specs=[pl.BlockSpec((row_tile, LANE), lambda i: (i, 0)),
                  pl.BlockSpec((row_tile, LANE), lambda i: (i, 0))],
        out_specs=pl.BlockSpec((1, 1), lambda i: (0, 0)),
        scratch_shapes=[pltpu.VMEM((row_tile, LANE), F32)],
        compiler_params=pltpu.CompilerParams(
            dimension_semantics=("arbitrary",),
            vmem_limit_bytes=VMEM_LIMIT),
    )(p2, t2)
    return out[0, 0]


# ----------------------------------------------------------------------------
# Instance-discrimination loss, fused:
#   kernel A (grid B x T): accumulate t[b] = m[b] @ g[b]^T over HW/16 tiles, rsqrt-normalize.
#   kernel B (grid T):     per tile, recompute logits[b] = tn[b] @ g[b] in VMEM, run the
#                          cross-batch logsumexp (streaming-merge over batches) and accumulate
#                          per-pixel (lse_den - lse_num); logits never written to HBM.
# ----------------------------------------------------------------------------
def _inst_t_kernel(g_ref, m_ref, tn_ref):
    ti = pl.program_id(1)

    @pl.when(ti == 0)
    def _init():
        tn_ref[...] = jnp.zeros_like(tn_ref)

    g = g_ref[0]                                        # [D, tile] f32
    m = m_ref[0].astype(F32)                            # [K, tile]
    tn_ref[0] += lax.dot_general(m, g, (((1,), (1,)), ((), ())),
                                 preferred_element_type=F32)      # [K, D]

    @pl.when(ti == pl.num_programs(1) - 1)
    def _fin():
        t = tn_ref[0]
        # F.normalize(dim=-1): t / max(||t||, 1e-12) == t * rsqrt(max(||t||^2, 1e-24))  (EUP)
        inv = lax.rsqrt(jnp.maximum(jnp.sum(t * t, axis=-1, keepdims=True), 1e-24))
        tn_ref[0] = t * inv


def _inst_loss_kernel(tn_ref, g_ref, m_ref, out_ref, acc_ref, *,
                      sizes, inv_temp, inv_count):
    i = pl.program_id(0)

    @pl.when(i == 0)
    def _init():
        acc_ref[...] = jnp.zeros_like(acc_ref)

    lanes = acc_ref.shape[-1]
    NEG = jnp.float32(-1e30)
    run_m_d = jnp.full((1, lanes), NEG, F32)
    run_s_d = jnp.zeros((1, lanes), F32)
    run_m_n = jnp.full((1, lanes), NEG, F32)
    run_s_n = jnp.zeros((1, lanes), F32)

    for b, e in enumerate(sizes):                       # static python loop (host-known sizes)
        if e == 0:
            continue
        tn_b = tn_ref[b][:e, :]                         # [e, D] f32 (first e masks, as in ref)
        lg = jnp.dot(tn_b, g_ref[b],
                     preferred_element_type=F32) * inv_temp       # [e, tile]
        m_b = m_ref[b][:e, :].astype(F32)               # [e, tile]

        # streaming logsumexp merge (denominator: raw logits)
        md = jnp.max(lg, axis=0, keepdims=True)
        sd = jnp.sum(jnp.exp(lg - md), axis=0, keepdims=True)
        nm = jnp.maximum(run_m_d, md)
        run_s_d = run_s_d * jnp.exp(run_m_d - nm) + sd * jnp.exp(md - nm)
        run_m_d = nm

        # numerator: m * logits (zeros kept, exactly as torch.logsumexp(m*logits))
        nv = m_b * lg
        mn = jnp.max(nv, axis=0, keepdims=True)
        sn = jnp.sum(jnp.exp(nv - mn), axis=0, keepdims=True)
        nm2 = jnp.maximum(run_m_n, mn)
        run_s_n = run_s_n * jnp.exp(run_m_n - nm2) + sn * jnp.exp(mn - nm2)
        run_m_n = nm2

    lse_d = run_m_d + jnp.log(run_s_d)
    lse_n = run_m_n + jnp.log(run_s_n)
    acc_ref[...] += lse_d - lse_n                       # padded pixels contribute exactly 0

    @pl.when(i == pl.num_programs(0) - 1)
    def _fin():
        out_ref[...] = jnp.sum(acc_ref[...], keepdims=True) * inv_count


def cal_instance_dis_loss(mask_features, target_mask, target_sizes, temp):
    target_mask = target_mask[..., ::4, ::4]            # [B, K, H/4, W/4]
    B, D = mask_features.shape[:2]
    K = target_mask.shape[1]
    H4, W4 = mask_features.shape[-2:]
    HW4 = H4 * W4
    g = mask_features.reshape(B, D, HW4).astype(F32)    # keep f32: goes through normalize+exp
    m = target_mask.reshape(B, K, HW4).astype(BF16)     # binary -> exact in bf16

    tile4, hw4_pad = _plan_tiles(HW4, B * (D * 4 + K * 2))
    if hw4_pad != HW4:                                  # zero-pad: padded pixels add 0 loss
        g = jnp.pad(g, ((0, 0), (0, 0), (0, hw4_pad - HW4)))
        m = jnp.pad(m, ((0, 0), (0, 0), (0, hw4_pad - HW4)))
    T4 = hw4_pad // tile4

    tn = pl.pallas_call(
        _inst_t_kernel,
        out_shape=jax.ShapeDtypeStruct((B, K, D), F32),
        grid=(B, T4),
        in_specs=[pl.BlockSpec((1, D, tile4), lambda b, i: (b, 0, i)),
                  pl.BlockSpec((1, K, tile4), lambda b, i: (b, 0, i))],
        out_specs=pl.BlockSpec((1, K, D), lambda b, i: (b, 0, 0)),
        compiler_params=pltpu.CompilerParams(
            dimension_semantics=("parallel", "arbitrary"),
            vmem_limit_bytes=VMEM_LIMIT),
    )(g, m)

    sizes = tuple(int(s) for s in target_sizes)
    kern = functools.partial(_inst_loss_kernel, sizes=sizes,
                             inv_temp=1.0 / float(temp), inv_count=1.0 / float(HW4))
    out = pl.pallas_call(
        kern,
        out_shape=jax.ShapeDtypeStruct((1, 1), F32),
        grid=(T4,),
        in_specs=[pl.BlockSpec((B, K, D), lambda i: (0, 0, 0)),
                  pl.BlockSpec((B, D, tile4), lambda i: (0, 0, i)),
                  pl.BlockSpec((B, K, tile4), lambda i: (0, 0, i))],
        out_specs=pl.BlockSpec((1, 1), lambda i: (0, 0)),
        scratch_shapes=[pltpu.VMEM((1, tile4), F32)],
        compiler_params=pltpu.CompilerParams(
            dimension_semantics=("arbitrary",),
            vmem_limit_bytes=VMEM_LIMIT),
    )(tn, g, m)
    return out[0, 0]


# ----------------------------------------------------------------------------
# Criterion (no learnable parameters; nn.CrossEntropyLoss in the reference is unused)
# ----------------------------------------------------------------------------
class Criterion:
    def __init__(self, alpha=0.5, alpha_L=0.5, lambda_1=3.0, lambda_2=1.0,
                 lambda_3=1.0, lambda_4=1.0):
        self.temp = 0.3
        self.eps = 1e-05
        self.alpha = alpha
        self.alpha_L = alpha_L
        self.lambda_1 = lambda_1
        self.lambda_2 = lambda_2
        self.lambda_3 = lambda_3
        self.lambda_4 = lambda_4

    def __call__(self, y_p, y_gt, m_p, m_gt, A_p, A_gt, semantic_mask,
                 semantic_mask_gt, mask_features, gt_size):
        gt_size_np = np.asarray(jax.device_get(gt_size))

        # 1) one streaming pass over the full-res masks: similarity + dice partial sums.
        sim, num, mpsq, mgts = matching_sim(y_p, y_gt, m_p, m_gt)

        # 2) dispatch the match-independent losses now so they run on-device while the host
        #    is busy with the Hungarian solve below.
        seg_loss = cal_semantic_segmentation_loss(semantic_mask, semantic_mask_gt)
        inst_loss = cal_instance_dis_loss(mask_features, m_gt, gt_size_np, self.temp)

        # 3) the only host sync: Hungarian assignment on the device-computed similarity.
        sim_np = np.asarray(jax.device_get(sim))
        inp_pos, gt_pos, inp_neg = hungarian_assign(sim_np, gt_size_np)

        # 4) match-dependent losses: tiny gathers / vector ops in plain JAX (dice sums reused).
        det_loss = cal_det_loss(y_p, y_gt, num, mpsq, mgts,
                                inp_pos, gt_pos, inp_neg, self.alpha)
        lay_loss = cal_lay_loss(inp_pos, gt_pos, A_p, A_gt, gt_size_np,
                                self.alpha_L, self.eps)

        return (self.lambda_1 * det_loss + self.lambda_2 * lay_loss +
                self.lambda_3 * seg_loss + self.lambda_4 * inst_loss)


if __name__ == "__main__":
    key = jax.random.PRNGKey(0)
    ks = jax.random.split(key, 10)

    B, N, K, H, W, D = 2, 8, 6, 16, 16, 32

    y_p = jax.nn.sigmoid(jax.random.normal(ks[0], (B, N), dtype=F32))
    y_gt = jax.random.uniform(ks[1], (B, K), dtype=F32, minval=0.1, maxval=0.9)
    m_p = jax.nn.sigmoid(jax.random.normal(ks[2], (B, N, H, W), dtype=F32))
    m_gt = (jax.random.uniform(ks[3], (B, K, H, W)) > 0.5).astype(F32)
    A_p = jax.nn.sigmoid(jax.random.normal(ks[4], (B, N, N), dtype=F32))
    A_gt = (jax.random.uniform(ks[5], (B, K, K)) > 0.5).astype(F32)
    semantic_mask = jax.nn.sigmoid(jax.random.normal(ks[6], (B, 1, H, W), dtype=F32))
    semantic_mask_gt = (jax.random.uniform(ks[7], (B, H, W)) > 0.5).astype(F32)
    mask_features = jax.random.normal(ks[8], (B, D, H // 4, W // 4), dtype=F32)
    gt_size = np.array([3, 5], dtype=np.int32)

    criterion = Criterion()
    loss = criterion(y_p, y_gt, m_p, m_gt, A_p, A_gt, semantic_mask,
                     semantic_mask_gt, mask_features, gt_size)
    jax.block_until_ready(loss)
    assert np.isfinite(float(loss))
    print("KERNEL_OK")
</pallas_src>

<mosaic_0001>
module attributes {stable_mosaic.version = 11 : i64} {
  func.func @_sim_kernel(%arg0: i32, %arg1: i32, %arg2: memref<1x8x1xf32, #tpu.memory_space<vmem>>, %arg3: memref<1x1x6xf32, #tpu.memory_space<vmem>>, %arg4: memref<1x8x256xbf16, #tpu.memory_space<vmem>>, %arg5: memref<1x6x256xbf16, #tpu.memory_space<vmem>>, %arg6: memref<1x8x6xf32, #tpu.memory_space<vmem>>, %arg7: memref<1x8x6xf32, #tpu.memory_space<vmem>>, %arg8: memref<1x8x1xf32, #tpu.memory_space<vmem>>, %arg9: memref<1x6x1xf32, #tpu.memory_space<vmem>>) attributes {dimension_semantics = [#tpu.dimension_semantics<parallel>, #tpu.dimension_semantics<arbitrary>], iteration_bounds = array<i64: 2, 1>, scalar_prefetch = 0 : i64, scratch_operands = 0 : i64, tpu.core_type = #tpu.core_type<tc>, window_params = [{transform_indices = @transform_0, window_bounds = array<i64: 1, 8, 1>}, {transform_indices = @transform_1, window_bounds = array<i64: 1, 1, 6>}, {transform_indices = @transform_2, window_bounds = array<i64: 1, 8, 256>}, {transform_indices = @transform_3, window_bounds = array<i64: 1, 6, 256>}, {transform_indices = @transform_4, window_bounds = array<i64: 1, 8, 6>}, {transform_indices = @transform_5, window_bounds = array<i64: 1, 8, 6>}, {transform_indices = @transform_6, window_bounds = array<i64: 1, 8, 1>}, {transform_indices = @transform_7, window_bounds = array<i64: 1, 6, 1>}]} {
    %c0_i32 = arith.constant 0 : i32
    %0 = arith.cmpi eq, %arg1, %c0_i32 : i32
    %1 = arith.extui %0 : i1 to i32
    %c0_i32_0 = arith.constant 0 : i32
    %2 = arith.cmpi ne, %1, %c0_i32_0 : i32
    scf.if %2 {
      %cst_28 = arith.constant 0.000000e+00 : f32
      %36 = vector.broadcast %cst_28 : f32 to vector<1x8x6xf32>
      %c0_29 = arith.constant 0 : index
      %c0_30 = arith.constant 0 : index
      %c0_31 = arith.constant 0 : index
      %37 = vector.load %arg7[%c0_29, %c0_30, %c0_31] : memref<1x8x6xf32, #tpu.memory_space<vmem>>, vector<1x8x6xf32>
      tpu.vector_store %arg7[%c0_29, %c0_30, %c0_31], %36 {strides = array<i32>} : memref<1x8x6xf32, #tpu.memory_space<vmem>>, vector<1x8x6xf32>,
      %cst_32 = arith.constant 0.000000e+00 : f32
      %38 = vector.broadcast %cst_32 : f32 to vector<1x8x1xf32>
      %c0_33 = arith.constant 0 : index
      %c0_34 = arith.constant 0 : index
      %c0_35 = arith.constant 0 : index
      %39 = vector.load %arg8[%c0_33, %c0_34, %c0_35] : memref<1x8x1xf32, #tpu.memory_space<vmem>>, vector<1x8x1xf32>
      tpu.vector_store %arg8[%c0_33, %c0_34, %c0_35], %38 {strides = array<i32>} : memref<1x8x1xf32, #tpu.memory_space<vmem>>, vector<1x8x1xf32>,
      %cst_36 = arith.constant 0.000000e+00 : f32
      %40 = vector.broadcast %cst_36 : f32 to vector<1x6x1xf32>
      %c0_37 = arith.constant 0 : index
      %c0_38 = arith.constant 0 : index
      %c0_39 = arith.constant 0 : index
      %41 = vector.load %arg9[%c0_37, %c0_38, %c0_39] : memref<1x6x1xf32, #tpu.memory_space<vmem>>, vector<1x6x1xf32>
      tpu.vector_store %arg9[%c0_37, %c0_38, %c0_39], %40 {strides = array<i32>} : memref<1x6x1xf32, #tpu.memory_space<vmem>>, vector<1x6x1xf32>,
    } else {
    }
    %c0 = arith.constant 0 : index
    %c0_1 = arith.constant 0 : index
    %c0_2 = arith.constant 0 : index
    %3 = vector.load %arg4[%c0, %c0_1, %c0_2] : memref<1x8x256xbf16, #tpu.memory_space<vmem>>, vector<1x8x256xbf16>
    %4 = vector.shape_cast %3 : vector<1x8x256xbf16> to vector<8x256xbf16>
    %c0_3 = arith.constant 0 : index
    %c0_4 = arith.constant 0 : index
    %c0_5 = arith.constant 0 : index
    %5 = vector.load %arg5[%c0_3, %c0_4, %c0_5] : memref<1x6x256xbf16, #tpu.memory_space<vmem>>, vector<1x6x256xbf16>
    %6 = vector.shape_cast %5 : vector<1x6x256xbf16> to vector<6x256xbf16>
    %c0_6 = arith.constant 0 : index
    %c0_7 = arith.constant 0 : index
    %c0_8 = arith.constant 0 : index
    %7 = vector.load %arg7[%c0_6, %c0_7, %c0_8] : memref<1x8x6xf32, #tpu.memory_space<vmem>>, vector<1x8x6xf32>
    %8 = vector.shape_cast %7 : vector<1x8x6xf32> to vector<8x6xf32>
    %cst = arith.constant dense<0.000000e+00> : vector<8x6xf32>
    %9 = tpu.matmul %4, %6, %cst {dimension_numbers = #tpu.dot_dimension_numbers<[1], [1], [0], [0], [0, 0, 1, 0], [], []>} : vector<8x256xbf16>, vector<6x256xbf16>, vector<8x6xf32> -> vector<8x6xf32>
    %10 = arith.addf %8, %9 : vector<8x6xf32>
    %c0_9 = arith.constant 0 : index
    %c0_10 = arith.constant 0 : index
    %c0_11 = arith.constant 0 : index
    %11 = vector.load %arg7[%c0_9, %c0_10, %c0_11] : memref<1x8x6xf32, #tpu.memory_space<vmem>>, vector<1x8x6xf32>
    %12 = vector.shape_cast %11 : vector<1x8x6xf32> to vector<8x6xf32>
    %13 = vector.shape_cast %10 : vector<8x6xf32> to vector<1x8x6xf32>
    tpu.vector_store %arg7[%c0_9, %c0_10, %c0_11], %13 {strides = array<i32>} : memref<1x8x6xf32, #tpu.memory_space<vmem>>, vector<1x8x6xf32>,
    %14 = arith.extf %4 : vector<8x256xbf16> to vector<8x256xf32>
    %c0_12 = arith.constant 0 : index
    %c0_13 = arith.constant 0 : index
    %c0_14 = arith.constant 0 : index
    %15 = vector.load %arg8[%c0_12, %c0_13, %c0_14] : memref<1x8x1xf32, #tpu.memory_space<vmem>>, vector<1x8x1xf32>
    %16 = vector.shape_cast %15 : vector<1x8x1xf32> to vector<8x1xf32>
    %17 = arith.mulf %14, %14 : vector<8x256xf32>
    %cst_15 = arith.constant dense<0.000000e+00> : vector<8xf32>
    %18 = vector.multi_reduction <add>, %17, %cst_15 [1] : vector<8x256xf32> to vector<8xf32>
    %19 = vector.shape_cast %18 : vector<8xf32> to vector<8x1xf32>
    %20 = arith.addf %16, %19 : vector<8x1xf32>
    %c0_16 = arith.constant 0 : index
    %c0_17 = arith.constant 0 : index
    %c0_18 = arith.constant 0 : index
    %21 = vector.load %arg8[%c0_16, %c0_17, %c0_18] : memref<1x8x1xf32, #tpu.memory_space<vmem>>, vector<1x8x1xf32>
    %22 = vector.shape_cast %21 : vector<1x8x1xf32> to vector<8x1xf32>
    %23 = vector.shape_cast %20 : vector<8x1xf32> to vector<1x8x1xf32>
    tpu.vector_store %arg8[%c0_16, %c0_17, %c0_18], %23 {strides = array<i32>} : memref<1x8x1xf32, #tpu.memory_space<vmem>>, vector<1x8x1xf32>,
    %c0_19 = arith.constant 0 : index
    %c0_20 = arith.constant 0 : index
    %c0_21 = arith.constant 0 : index
    %24 = vector.load %arg9[%c0_19, %c0_20, %c0_21] : memref<1x6x1xf32, #tpu.memory_space<vmem>>, vector<1x6x1xf32>
    %25 = vector.shape_cast %24 : vector<1x6x1xf32> to vector<6x1xf32>
    %26 = arith.extf %6 : vector<6x256xbf16> to vector<6x256xf32>
    %cst_22 = arith.constant dense<0.000000e+00> : vector<6xf32>
    %27 = vector.multi_reduction <add>, %26, %cst_22 [1] : vector<6x256xf32> to vector<6xf32>
    %28 = vector.shape_cast %27 : vector<6xf32> to vector<6x1xf32>
    %29 = arith.addf %25, %28 : vector<6x1xf32>
    %c0_23 = arith.constant 0 : index
    %c0_24 = arith.constant 0 : index
    %c0_25 = arith.constant 0 : index
    %30 = vector.load %arg9[%c0_23, %c0_24, %c0_25] : memref<1x6x1xf32, #tpu.memory_space<vmem>>, vector<1x6x1xf32>
    %31 = vector.shape_cast %30 : vector<1x6x1xf32> to vector<6x1xf32>
    %32 = vector.shape_cast %29 : vector<6x1xf32> to vector<1x6x1xf32>
    tpu.vector_store %arg9[%c0_23, %c0_24, %c0_25], %32 {strides = array<i32>} : memref<1x6x1xf32, #tpu.memory_space<vmem>>, vector<1x6x1xf32>,
    %c0_i32_26 = arith.constant 0 : i32
    %33 = arith.cmpi eq, %arg1, %c0_i32_26 : i32
    %34 = arith.extui %33 : i1 to i32
    %c0_i32_27 = arith.constant 0 : i32
    %35 = arith.cmpi ne, %34, %c0_i32_27 : i32
    scf.if %35 {
      %c0_28 = arith.constant 0 : index
      %c0_29 = arith.constant 0 : index
      %c0_30 = arith.constant 0 : index
      %36 = vector.load %arg2[%c0_28, %c0_29, %c0_30] : memref<1x8x1xf32, #tpu.memory_space<vmem>>, vector<1x8x1xf32>
      %37 = vector.shape_cast %36 : vector<1x8x1xf32> to vector<8x1xf32>
      %c0_31 = arith.constant 0 : index
      %c0_32 = arith.constant 0 : index
      %c0_33 = arith.constant 0 : index
      %38 = vector.load %arg3[%c0_31, %c0_32, %c0_33] : memref<1x1x6xf32, #tpu.memory_space<vmem>>, vector<1x1x6xf32>
      %39 = vector.shape_cast %38 : vector<1x1x6xf32> to vector<1x6xf32>
      %40 = vector.broadcast %37 : vector<8x1xf32> to vector<8x6xf32>
      %41 = vector.broadcast %39 : vector<1x6xf32> to vector<8x6xf32>
      %42 = arith.mulf %40, %41 : vector<8x6xf32>
      %cst_34 = arith.constant 1.000000e+00 : f32
      %43 = vector.broadcast %cst_34 : f32 to vector<8x1xf32>
      %44 = arith.subf %43, %37 : vector<8x1xf32>
      %cst_35 = arith.constant 1.000000e+00 : f32
      %45 = vector.broadcast %cst_35 : f32 to vector<1x6xf32>
      %46 = arith.subf %45, %39 : vector<1x6xf32>
      %47 = vector.broadcast %44 : vector<8x1xf32> to vector<8x6xf32>
      %48 = vector.broadcast %46 : vector<1x6xf32> to vector<8x6xf32>
      %49 = arith.mulf %47, %48 : vector<8x6xf32>
      %50 = arith.addf %42, %49 : vector<8x6xf32>
      %c0_36 = arith.constant 0 : index
      %c0_37 = arith.constant 0 : index
      %c0_38 = arith.constant 0 : index
      %51 = vector.load %arg8[%c0_36, %c0_37, %c0_38] : memref<1x8x1xf32, #tpu.memory_space<vmem>>, vector<1x8x1xf32>
      %52 = vector.shape_cast %51 : vector<1x8x1xf32> to vector<8x1xf32>
      %c0_39 = arith.constant 0 : index
      %c0_40 = arith.constant 0 : index
      %c0_41 = arith.constant 0 : index
      %53 = vector.load %arg9[%c0_39, %c0_40, %c0_41] : memref<1x6x1xf32, #tpu.memory_space<vmem>>, vector<1x6x1xf32>
      %54 = vector.shape_cast %53 : vector<1x6x1xf32> to vector<6x1xf32>
      %55 = tpu.transpose %54, [1, 0] : vector<6x1xf32> -> vector<1x6xf32>
      %56 = vector.broadcast %52 : vector<8x1xf32> to vector<8x6xf32>
      %57 = vector.broadcast %55 : vector<1x6xf32> to vector<8x6xf32>
      %58 = arith.addf %56, %57 : vector<8x6xf32>
      %c0_42 = arith.constant 0 : index
      %c0_43 = arith.constant 0 : index
      %c0_44 = arith.constant 0 : index
      %59 = vector.load %arg7[%c0_42, %c0_43, %c0_44] : memref<1x8x6xf32, #tpu.memory_space<vmem>>, vector<1x8x6xf32>
      %60 = vector.shape_cast %59 : vector<1x8x6xf32> to vector<8x6xf32>
      %cst_45 = arith.constant 2.000000e+00 : f32
      %61 = vector.broadcast %cst_45 : f32 to vector<8x6xf32>
      %62 = arith.mulf %61, %60 : vector<8x6xf32>
      %63 = arith.divf %62, %58 : vector<8x6xf32>
      %64 = arith.mulf %50, %63 : vector<8x6xf32>
      %c0_46 = arith.constant 0 : index
      %c0_47 = arith.constant 0 : index
      %c0_48 = arith.constant 0 : index
      %65 = vector.load %arg6[%c0_46, %c0_47, %c0_48] : memref<1x8x6xf32, #tpu.memory_space<vmem>>, vector<1x8x6xf32>
      %66 = vector.shape_cast %65 : vector<1x8x6xf32> to vector<8x6xf32>
      %67 = vector.shape_cast %64 : vector<8x6xf32> to vector<1x8x6xf32>
      tpu.vector_store %arg6[%c0_46, %c0_47, %c0_48], %67 {strides = array<i32>} : memref<1x8x6xf32, #tpu.memory_space<vmem>>, vector<1x8x6xf32>,
    } else {
    }
    return
  }
  func.func @transform_0(%arg0: i32, %arg1: i32) -> (i32, i32, i32) {
    %c0_i32 = arith.constant 0 : i32
    %c0_i32_0 = arith.constant 0 : i32
    %c0_i32_1 = arith.constant 0 : i32
    return %arg0, %c0_i32, %c0_i32_0 : i32, i32, i32
  }
  func.func @transform_1(%arg0: i32, %arg1: i32) -> (i32, i32, i32) {
    %c0_i32 = arith.constant 0 : i32
    %c0_i32_0 = arith.constant 0 : i32
    %c0_i32_1 = arith.constant 0 : i32
    return %arg0, %c0_i32, %c0_i32_0 : i32, i32, i32
  }
  func.func @transform_2(%arg0: i32, %arg1: i32) -> (i32, i32, i32) {
    %c0_i32 = arith.constant 0 : i32
    %c0_i32_0 = arith.constant 0 : i32
    return %arg0, %c0_i32, %arg1 : i32, i32, i32
  }
  func.func @transform_3(%arg0: i32, %arg1: i32) -> (i32, i32, i32) {
    %c0_i32 = arith.constant 0 : i32
    %c0_i32_0 = arith.constant 0 : i32
    return %arg0, %c0_i32, %arg1 : i32, i32, i32
  }
  func.func @transform_4(%arg0: i32, %arg1: i32) -> (i32, i32, i32) {
    %c0_i32 = arith.constant 0 : i32
    %c0_i32_0 = arith.constant 0 : i32
    %c0_i32_1 = arith.constant 0 : i32
    return %arg0, %c0_i32, %c0_i32_0 : i32, i32, i32
  }
  func.func @transform_5(%arg0: i32, %arg1: i32) -> (i32, i32, i32) {
    %c0_i32 = arith.constant 0 : i32
    %c0_i32_0 = arith.constant 0 : i32
    %c0_i32_1 = arith.constant 0 : i32
    return %arg0, %c0_i32, %c0_i32_0 : i32, i32, i32
  }
  func.func @transform_6(%arg0: i32, %arg1: i32) -> (i32, i32, i32) {
    %c0_i32 = arith.constant 0 : i32
    %c0_i32_0 = arith.constant 0 : i32
    %c0_i32_1 = arith.constant 0 : i32
    return %arg0, %c0_i32, %c0_i32_0 : i32, i32, i32
  }
  func.func @transform_7(%arg0: i32, %arg1: i32) -> (i32, i32, i32) {
    %c0_i32 = arith.constant 0 : i32
    %c0_i32_0 = arith.constant 0 : i32
    %c0_i32_1 = arith.constant 0 : i32
    return %arg0, %c0_i32, %c0_i32_0 : i32, i32, i32
  }
}

</mosaic_0001>

<bundles_post_ra>
// kernel: tpu_custom_call.1
= control target key start
LH: loop header
LB: loop body
LE: loop exit
PB: predicated region body
PF: predicated region fallthrough
CT: control target
= control target key end

     0   :  { %s900_s24 = smov 0   ;;  %s902_s25 = smov 0   ;;  %s975_s0 = inlined_call_operand.vmem [shape: f32[2,8,1], index: 0, kind: input, shape index: {}]   ;;  %s976_s1 = inlined_call_operand.vmem [shape: f32[2,1,6], index: 1, kind: input, shape index: {}]   ;;  %s977_s2 = inlined_call_operand.vmem [shape: bf16[2,8,256], index: 2, kind: input, shape index: {}]   ;;  %s978_s3 = inlined_call_operand.vmem [shape: bf16[2,6,256], index: 3, kind: input, shape index: {}]   ;;  %s979_s4 = inlined_call_operand.vmem [shape: f32[2,8,6], index: 4, kind: output, shape index: {0}]   ;;  %s980_s5 = inlined_call_operand.vmem [shape: f32[2,8,6], index: 5, kind: output, shape index: {1}]   ;;  %s981_s6 = inlined_call_operand.vmem [shape: f32[2,8,1], index: 6, kind: output, shape index: {2}]   ;;  %s982_s7 = inlined_call_operand.vmem [shape: f32[2,6,1], index: 7, kind: output, shape index: {3}]  }
   0x1   :  { %s904_s26 = smov 0  }
   0x2 LB: > { %s30_s27 = sadd.s32 1, %s852_s25  ;;  %p782_p0 = scmp.ge.s32.totalorder %s856_s26, 1  ;;  %s856_s26 = sphi %s904_s26, %s18_s26   ;;  %s852_s25 = sphi %s902_s25, %s984_s25   ;;  %s848_s24 = sphi %s900_s24, %s983_s24  }
   0x3   : > { %p32_p1 = scmp.ge.s32.totalorder %s30_s27, 2  ;;  %p297_p2 = scmp.lt.s32.totalorder %s856_s26, 3 }
   0x5   : > { %s986_s27 = smov (%p32_p1, %s30_s27), 0  ;;  %p298_p3 = pnand %p782_p0, %p297_p2 }
   0x6   : > { %p360_p4 = scmp.lt.s32.totalorder (!%p298_p3), %s848_s24, 1 }
   0x7   : > { %301 = sbr.rel (%p298_p3) target bundleno = 359 (0x167), region = 36 }
   0xc   : > { %s988_s24 = smov (!%p360_p4, %s848_s24), 1  ;;  %vm410_vm0 = vcmask 7168   ;;  %vm488_vm1 = vcmask 1045504   ;;  %v858_v6 = vmov 0.0   ;;  %v859_v17 = vmov 0  }
   0xd   : > { %s921_s28 = sshll.u32 %s988_s24, 3  ;;  %827 = vset.pattern.permute.xlu0 %v859_v17  ;;  %826 = vset.pattern.permute.xlu1 %v859_v17  ;;  %vm412_vm2 = vcmask 5120   ;;  %vm408_vm3 = vcmask 48128   ;;  %v508_v35 = vlaneseq }
   0xe   : > { %s375_s8 = scalar_lea.vmem %s977_s2, %s921_s28  ;;  %s385_s11 = scalar_lea.vmem %s978_s3, %s921_s28 }
   0xf   : > { %v414_v0 = vld [vmem:[%s375_s8] sm:$0xff]  ;;  %s935_s14 = scalar_lea.vmem %s981_s6, %s921_s28  ;;  %s363_s17 = scalar_lea.vmem %s975_s0, %s921_s28  ;;  %v509_v36 = vshrl.u32 %v508_v35, 7 }
  0x10   : > { %v415_v1 = vld [vmem:[%s385_s11] sm:$0x77]  ;;  %v474_v2 = vunpack.c.l.bf16 %v414_v0  ;;  %v475_v3 = vunpack.c.h.bf16 %v414_v0  ;;  %411 = vst.msk [vmem:[%s935_s14] sm:$0xff] %vm410_vm0, %v858_v6  ;;  %v793_v9 = vcombine.high %v414_v0, %v414_v0  ;;  %v792_v16 = vcombine.low %v414_v0, %v414_v0  ;;  %s402_s20 = scalar_lea.vmem %s982_s7, %s921_s28  ;;  %s394_s23 = scalar_lea.vmem %s980_s5, %s921_s28 }
  0x11   : > { %v486_v4 = vunpack.c.l.bf16 %v415_v1  ;;  %v487_v5 = vunpack.c.h.bf16 %v415_v1  ;;  %v795_v7 = vcombine.high %v415_v1, %v415_v1  ;;  %v794_v8 = vcombine.low %v415_v1, %v415_v1  ;;  %v500_v18 = vld [vmem:[%s363_s17] sm:$0xff]  ;;  %413 = vst.msk [vmem:[%s402_s20] sm:$0x3f] %vm412_vm2, %v858_v6  ;;  %s366_s8 = scalar_lea.vmem %s976_s1, %s988_s24  ;;  %s390_s24 = scalar_lea.vmem %s979_s4, %s921_s28 }
  0x12   : > { %v477_v10 = vmul.f32 %v474_v2, %v474_v2  ;;  %v478_v11 = vmul.f32 %v475_v3, %v475_v3  ;;  %463 = vmatprep.mubr.bf16.mxu0 %v793_v9  ;;  %504 = vperm.xlu1 %826, %v500_v18   ;;  %v514_v19 = vsub.f32 1.0, %v500_v18  ;;  %409 = vst.msk [vmem:[%s394_s23] sm:$0xff] %vm408_vm3, %v858_v6  ;;  %v510_v38 = vsub.s32 0, %v509_v36  ;;  %v501_v42 = vld [vmem:[%s366_s8] sm:$0x1] }
  0x13   : > { %v489_v12 = vsel %vm488_vm1, %v486_v4, 0.0  ;;  %v490_v13 = vsel %vm488_vm1, %v487_v5, 0.0  ;;  %445 = vmatprep.subr.bf16.mxu0 %v795_v7  ;;  %v515_v43 = vsub.f32 1.0, %v501_v42 }
  0x14   : > { %v479_v14 = vadd.f32 %v478_v11, %v477_v10  ;;  %446 = vmatpush1.bf16.xpose.msra.mxu0 %v794_v8  ;;  %v491_v15 = vadd.f32 %v490_v13, %v489_v12  ;;  %v511_v44 = vrot.slane %v501_v42, %v510_v38 }
  0x15   : > { %v525_v45 = vrot.slane %v515_v43, %v510_v38 }
  0x16   : > { %480 = vadd.xlane.f32.xlu0 %v479_v14 }
  0x17   : > { %v476_v20 = vld [vmem:[%s935_s14] sm:$0xff] }
  0x18   : > { %v485_v23 = vld [vmem:[%s402_s20] sm:$0x3f] }
  0x19   : > { %v416_v28 = vld [vmem:[%s394_s23] sm:$0xff] }
  0x1a   : > { %492 = vadd.xlane.f32.xlu0 %v491_v15 }
  0x1b   : > { %464 = vmatmul.mubr.bf16.vlgmr.msra.gmra.mxu0 %v792_v16 }
  0x30   : > { %518 = vperm.xlu0 %827, %v514_v19  }
  0x8d   : > { %v505_v34 = vpop.permute.xlu1 %504 }
  0x8e   : > { %v513_v48 = vmul.f32 %v511_v44, %v505_v34 }
  0x9f   : > { %v481_v21 = vpop.xlane.xlu0 %480 }
  0xa0   : > { %v482_v22 = vadd.f32 %v481_v21, %v476_v20 }
  0xa2   : > { %484 = vst.msk [vmem:[%s935_s14] sm:$0xff] %vm410_vm0, %v482_v22 }
  0xa3   : > { %v493_v24 = vpop.xlane.xlu0 %492 }
  0xa4   : > { %v494_v25 = vadd.f32 %v493_v24, %v485_v23 }
  0xa6   : > { %496 = vst.msk [vmem:[%s402_s20] sm:$0x3f] %vm412_vm2, %v494_v25 }
  0xa9   : > { %v529_v26 = vld [vmem:[%s935_s14] sm:$0xff] }
  0xaa   : > { %565 = vperm.xlu1 %826, %v529_v26  }
  0xab   : > { %v519_v46 = vpop.permute.xlu0 %518 }
  0xac   : > { %v527_v49 = vmul.f32 %v525_v45, %v519_v46 }
  0xad   : > { %v530_v27 = vld [vmem:[%s402_s20] sm:$0x3f] }
  0xae   : > { %v528_v52 = vadd.f32 %v527_v49, %v513_v48 }
  0xd3   : > { %531 = vxpose.xlu1.b32.start.end [1/1] (short) (narrow) %v530_v27, 8 }
  0xdb   : > { %v465_v29 = vpop.f32.mrf.mxu0 }
  0xdc   : > { %v471_v30 = vadd.f32 %v465_v29, %v416_v28 }
  0xdd   : > { %v467_v31 = vpop.f32.mrf.mxu0 }
  0xde   : > { %473 = vst.msk [vmem:[%s394_s23] sm:$0xff] %vm408_vm3, %v471_v30 }
  0xdf   : > { %v468_v32 = vpop.f32.mrf.mxu0 }
  0xe1   : > { %v469_v33 = vpop.f32.mrf.mxu0 }
  0xe5   : > { %v573_v47 = vld [vmem:[%s394_s23] sm:$0xff] }
  0xe6   : > { %v574_v50 = vmul.f32 2.0, %v573_v47 }
 0x125   : > { %v566_v37 = vpop.permute.xlu1 %565 }
 0x14f   : > { %v547_v39 = vpop.trf.xlu1 }
 0x150   : > { %v571_v40 = vrot.slane %v547_v39, %v510_v38 }
 0x152   : > { %v572_v41 = vadd.f32 %v571_v40, %v566_v37 }
 0x154   : > { %832 = vrcp.f32 %v572_v41 }
 0x161   : > { %v833_v51 = vpop.eup %832 }
 0x162   : > { %v576_v53 = vmul.f32 %v833_v51, %v574_v50 }
 0x164   : > { %v577_v54 = vmul.f32 %v576_v53, %v528_v52 }
 0x166   : > { %578 = vst.msk [vmem:[%s390_s24] sm:$0xff] %vm408_vm3, %v577_v54 }
 0x167 PF: > { %s18_s26 = sadd.s32 1, %s856_s26   ;;  %s983_s24 = smov %s852_s25 }
 0x168   : > { %p15_p5 = scmp.ge.s32.totalorder %s18_s26, 4   ;;  %s984_s25 = smov %s986_s27 }
 0x16a   :  { %17 = sbr.rel (!%p15_p5) target bundleno = 2 (0x2), region = 119 }

</bundles_post_ra>
